<compile_context>
chip_gen: v7x
topology: tpu7x:2x2x1
jax: 0.10.0
libtpu: 0.0.40
codegen_flags: <defaults>
</compile_context>

<pallas_src>
import functools

import jax
import jax.numpy as jnp
from jax import lax
from jax.experimental import pallas as pl
from jax.experimental.pallas import tpu as pltpu


def _round_up(v, m):
    return ((v + m - 1) // m) * m


def _tpu_device_info():
    """Best-effort (VMEM capacity bytes, TensorCores per device)."""
    vmem_cap = 128 << 20
    num_cores = 1
    try:
        info = pltpu.get_tpu_info()
        vmem_cap = int(getattr(info, "vmem_capacity_bytes", vmem_cap) or vmem_cap)
        num_cores = int(getattr(info, "num_cores", num_cores) or num_cores)
    except Exception:
        pass
    try:
        num_cores = max(num_cores,
                        int(getattr(jax.devices()[0], "num_cores", 1) or 1))
    except Exception:
        pass
    return vmem_cap, num_cores


def _conv_relu_kernel(x_ref, w_ref, b_ref, o_ref, *, Wp, k, out_L, relu):
    # x_ref: (nb, C_in, L_in)   H+W zero-padded, flattened, guard/lane-padded
    # w_ref: (C_out_t, k*k*C_in) tap-major / channel-minor
    # b_ref: (C_out_t, 1)        float32
    # o_ref: (nb, C_out_t, out_L)
    nb = x_ref.shape[0]
    starts = [kh * Wp + kw for kh in range(k) for kw in range(k)]  # static offsets

    w = w_ref[...]          # hoisted: weights stay staged across samples
    bias = b_ref[...]       # (C_out_t, 1) broadcasts over lanes

    def body(bi, carry):
        # Stage all k*k shifted taps as one (k*k*C_in, out_L) RHS, then do a
        # single K = k*k*C_in MXU contraction with f32 accumulation.
        rhs = jnp.concatenate(
            [x_ref[bi, :, pl.ds(s, out_L)] for s in starts], axis=0)
        y = jnp.dot(w, rhs, preferred_element_type=jnp.float32)
        y = y + bias
        if relu:
            y = jnp.maximum(y, 0.0)
        o_ref[bi] = y.astype(o_ref.dtype)   # store now -> bounded live ranges
        return carry

    lax.fori_loop(0, nb, body, 0, unroll=True)


def basic_conv_forward(x, w, b=None, *, stride=1, relu=True):
    """BasicConv forward: Conv2d(k, stride=1, padding=k//2, bias) [+ ReLU].

    x: (N, C_in, H, W) NCHW;  w: (C_out, C_in, k, k) OIHW;  b: (C_out,) or None.
    """
    if stride != 1:
        # TODO(synk): strided / transposed conv paths not implemented.
        raise NotImplementedError("only stride=1 is supported by this Pallas kernel")
    N, C_in, H, W = x.shape
    C_out, C_in_w, kh_, kw_ = w.shape
    assert C_in_w == C_in and kh_ == kw_ and kh_ % 2 == 1, \
        "square odd kernels with matching channels"
    k = kh_
    pad = k // 2
    Hp, Wp = H + 2 * pad, W + 2 * pad
    itemsize = jnp.dtype(x.dtype).itemsize

    # Output is computed over H full padded rows (Wp columns each); the pad
    # columns are junk and are sliced off in the wrapper.  Pad the flat output
    # length to a multiple of 128 so the store is unmasked / lane-dense.
    out_HW = H * Wp
    out_L = _round_up(out_HW, 128)
    # Largest static tap slice must stay in bounds of the flattened input.
    L_need = (k - 1) * (Wp + 1) + out_L
    L_in = _round_up(L_need, 128)

    # Zero-pad H AND W (no in-kernel masking), flatten spatial, guard-pad.
    xf = jnp.pad(x, ((0, 0), (0, 0), (pad, pad), (pad, pad)))
    xf = xf.reshape(N, C_in, Hp * Wp)
    xf = jnp.pad(xf, ((0, 0), (0, 0), (0, L_in - Hp * Wp)))

    K = k * k * C_in
    # (C_out, K): tap-major, channel-minor.  Keep the caller's dtype (bf16
    # stays bf16 -> half the DMA bytes and native MXU rate on v6e/v7x).
    w2 = jnp.transpose(w, (0, 2, 3, 1)).reshape(C_out, K).astype(x.dtype)
    if b is None:
        b = jnp.zeros((C_out,), jnp.float32)
    b2 = b.reshape(C_out, 1).astype(jnp.float32)

    # ---- generation-aware block sizing -------------------------------------
    vmem_cap, num_cores = _tpu_device_info()
    target = max(2 << 20, vmem_cap // 16)   # ~8 MiB on 128 MiB VMEM, ~4 MiB on 64 MiB

    in_per_sample = C_in * L_in * itemsize
    out_per_sample = C_out * out_L * itemsize
    nb_cap = max(1, int(target // max(1, in_per_sample + out_per_sample)))
    nb_cap = min(nb_cap, 16, N)
    if num_cores >= 2 and N >= num_cores:
        # Keep >= one grid step per TensorCore on multi-core chips; single-core
        # chips (v5e/v6e) instead take the largest block that fits the budget.
        nb_cap = min(nb_cap, max(1, N // num_cores))
    nb = max(d for d in range(1, N + 1) if N % d == 0 and d <= nb_cap)
    gb = N // nb

    # Optional C_out tiling: second parallel axis (feeds both TCs at batch 1
    # on v7x) and bounds the output block size.  Tiles stay multiples of 8.
    c_tile = C_out
    while (c_tile % 2 == 0 and (c_tile // 2) % 8 == 0 and
           ((num_cores >= 2 and gb * (C_out // c_tile) < num_cores) or
            nb * c_tile * out_L * itemsize > target)):
        c_tile //= 2
    gc = C_out // c_tile

    # Exact double-buffer VMEM need, clamped to 75% of physical capacity.
    def _r8(v):
        return _round_up(v, 8)
    in_block = nb * _r8(C_in) * L_in * itemsize
    out_block = nb * _r8(c_tile) * out_L * itemsize
    w_block = _r8(c_tile) * _round_up(K, 128) * itemsize
    b_block = _r8(c_tile) * 128 * 4
    rhs_tmp = _r8(K) * out_L * itemsize       # staged RHS (one sample at a time)
    acc_tmp = _r8(c_tile) * out_L * 4         # f32 matmul result
    needed = 2 * (in_block + out_block + w_block + b_block) + rhs_tmp + acc_tmp + (2 << 20)
    vmem_limit = min(int(0.75 * vmem_cap), max(int(needed), 8 << 20))

    kern = functools.partial(_conv_relu_kernel, Wp=Wp, k=k, out_L=out_L, relu=relu)
    out_flat = pl.pallas_call(
        kern,
        out_shape=jax.ShapeDtypeStruct((N, C_out, out_L), x.dtype),
        grid_spec=pltpu.PrefetchScalarGridSpec(
            num_scalar_prefetch=0,
            grid=(gb, gc),
            in_specs=[
                pl.BlockSpec((nb, C_in, L_in), lambda i, j: (i, 0, 0)),
                pl.BlockSpec((c_tile, K), lambda i, j: (j, 0)),
                pl.BlockSpec((c_tile, 1), lambda i, j: (j, 0)),
            ],
            out_specs=pl.BlockSpec((nb, c_tile, out_L), lambda i, j: (i, j, 0)),
        ),
        compiler_params=pltpu.CompilerParams(
            dimension_semantics=("parallel", "parallel"),
            vmem_limit_bytes=int(vmem_limit)),
    )(xf, w2, b2)

    # Layout plumbing in the wrapper: drop lane padding + W pad columns.
    y = out_flat[:, :, :out_HW].reshape(N, C_out, H, Wp)[:, :, :, :W]
    return y


def basic_conv_ref(x, w, b, *, stride=1, relu=True):
    """Pure-JAX reference mirroring PyTorch Conv2d(+bias)+ReLU exactly."""
    pad = w.shape[-1] // 2
    y = lax.conv_general_dilated(
        x, w, window_strides=(stride, stride),
        padding=[(pad, pad), (pad, pad)],
        dimension_numbers=("NCHW", "OIHW", "NCHW"),
        precision=lax.Precision.HIGHEST)
    y = y + b[None, :, None, None]
    if relu:
        y = jnp.maximum(y, 0.0)
    return y


if __name__ == "__main__":
    # BasicConv(in_channel=4, out_channel=8, kernel_size=3, stride=1)
    N, C_in, C_out, H, W = 2, 4, 8, 16, 16
    k, stride = 3, 1

    key = jax.random.PRNGKey(0)
    kx, kw_key, kb_key = jax.random.split(key, 3)
    x = jax.random.normal(kx, (N, C_in, H, W), dtype=jnp.float32)
    w = jax.random.normal(kw_key, (C_out, C_in, k, k), dtype=jnp.float32) * 0.2
    b = jax.random.normal(kb_key, (C_out,), dtype=jnp.float32) * 0.1

    out = basic_conv_forward(x, w, b, stride=stride, relu=True)
    jax.block_until_ready(out)

    ref = basic_conv_ref(x, w, b, stride=stride, relu=True)
    assert out.shape == ref.shape and out.dtype == x.dtype
    max_err = float(jnp.max(jnp.abs(out - ref)))
    assert jnp.allclose(out, ref, atol=1e-3, rtol=1e-3), max_err

    print("KERNEL_OK")
</pallas_src>

<mosaic_0001>
module attributes {stable_mosaic.version = 11 : i64} {
  func.func @_conv_relu_kernel(%arg0: i32, %arg1: i32, %arg2: memref<2x4x512xf32, #tpu.memory_space<vmem>>, %arg3: memref<8x36xf32, #tpu.memory_space<vmem>>, %arg4: memref<8x1xf32, #tpu.memory_space<vmem>>, %arg5: memref<2x8x384xf32, #tpu.memory_space<vmem>>) attributes {dimension_semantics = [#tpu.dimension_semantics<parallel>, #tpu.dimension_semantics<parallel>], iteration_bounds = array<i64: 1, 1>, scalar_prefetch = 0 : i64, scratch_operands = 0 : i64, tpu.core_type = #tpu.core_type<tc>, window_params = [{transform_indices = @transform_0, window_bounds = array<i64: 2, 4, 512>}, {transform_indices = @transform_1, window_bounds = array<i64: 8, 36>}, {transform_indices = @transform_2, window_bounds = array<i64: 8, 1>}, {transform_indices = @transform_3, window_bounds = array<i64: 2, 8, 384>}]} {
    %c0 = arith.constant 0 : index
    %c0_0 = arith.constant 0 : index
    %0 = vector.load %arg3[%c0, %c0_0] : memref<8x36xf32, #tpu.memory_space<vmem>>, vector<8x36xf32>
    %c0_1 = arith.constant 0 : index
    %c0_2 = arith.constant 0 : index
    %1 = vector.load %arg4[%c0_1, %c0_2] : memref<8x1xf32, #tpu.memory_space<vmem>>, vector<8x1xf32>
    %c0_i32 = arith.constant 0 : i32
    %2 = arith.index_cast %c0_i32 : i32 to index
    %c0_3 = arith.constant 0 : index
    %c0_4 = arith.constant 0 : index
    %3 = vector.load %arg2[%2, %c0_3, %c0_4] : memref<2x4x512xf32, #tpu.memory_space<vmem>>, vector<1x4x384xf32>
    %4 = vector.shape_cast %3 : vector<1x4x384xf32> to vector<4x384xf32>
    %5 = arith.index_cast %c0_i32 : i32 to index
    %c0_5 = arith.constant 0 : index
    %c1 = arith.constant 1 : index
    %6 = vector.load %arg2[%5, %c0_5, %c1] : memref<2x4x512xf32, #tpu.memory_space<vmem>>, vector<1x4x384xf32>
    %7 = vector.shape_cast %6 : vector<1x4x384xf32> to vector<4x384xf32>
    %8 = arith.index_cast %c0_i32 : i32 to index
    %c0_6 = arith.constant 0 : index
    %c2 = arith.constant 2 : index
    %9 = vector.load %arg2[%8, %c0_6, %c2] : memref<2x4x512xf32, #tpu.memory_space<vmem>>, vector<1x4x384xf32>
    %10 = vector.shape_cast %9 : vector<1x4x384xf32> to vector<4x384xf32>
    %11 = arith.index_cast %c0_i32 : i32 to index
    %c0_7 = arith.constant 0 : index
    %c18 = arith.constant 18 : index
    %12 = vector.load %arg2[%11, %c0_7, %c18] : memref<2x4x512xf32, #tpu.memory_space<vmem>>, vector<1x4x384xf32>
    %13 = vector.shape_cast %12 : vector<1x4x384xf32> to vector<4x384xf32>
    %14 = arith.index_cast %c0_i32 : i32 to index
    %c0_8 = arith.constant 0 : index
    %c19 = arith.constant 19 : index
    %15 = vector.load %arg2[%14, %c0_8, %c19] : memref<2x4x512xf32, #tpu.memory_space<vmem>>, vector<1x4x384xf32>
    %16 = vector.shape_cast %15 : vector<1x4x384xf32> to vector<4x384xf32>
    %17 = arith.index_cast %c0_i32 : i32 to index
    %c0_9 = arith.constant 0 : index
    %c20 = arith.constant 20 : index
    %18 = vector.load %arg2[%17, %c0_9, %c20] : memref<2x4x512xf32, #tpu.memory_space<vmem>>, vector<1x4x384xf32>
    %19 = vector.shape_cast %18 : vector<1x4x384xf32> to vector<4x384xf32>
    %20 = arith.index_cast %c0_i32 : i32 to index
    %c0_10 = arith.constant 0 : index
    %c36 = arith.constant 36 : index
    %21 = vector.load %arg2[%20, %c0_10, %c36] : memref<2x4x512xf32, #tpu.memory_space<vmem>>, vector<1x4x384xf32>
    %22 = vector.shape_cast %21 : vector<1x4x384xf32> to vector<4x384xf32>
    %23 = arith.index_cast %c0_i32 : i32 to index
    %c0_11 = arith.constant 0 : index
    %c37 = arith.constant 37 : index
    %24 = vector.load %arg2[%23, %c0_11, %c37] : memref<2x4x512xf32, #tpu.memory_space<vmem>>, vector<1x4x384xf32>
    %25 = vector.shape_cast %24 : vector<1x4x384xf32> to vector<4x384xf32>
    %26 = arith.index_cast %c0_i32 : i32 to index
    %c0_12 = arith.constant 0 : index
    %c38 = arith.constant 38 : index
    %27 = vector.load %arg2[%26, %c0_12, %c38] : memref<2x4x512xf32, #tpu.memory_space<vmem>>, vector<1x4x384xf32>
    %28 = vector.shape_cast %27 : vector<1x4x384xf32> to vector<4x384xf32>
    %29 = tpu.concatenate %4, %7, %10, %13, %16, %19, %22, %25, %28 in 0 : vector<4x384xf32>, vector<4x384xf32>, vector<4x384xf32>, vector<4x384xf32>, vector<4x384xf32>, vector<4x384xf32>, vector<4x384xf32>, vector<4x384xf32>, vector<4x384xf32> -> vector<36x384xf32>
    %cst = arith.constant dense<0.000000e+00> : vector<8x384xf32>
    %30 = tpu.matmul %0, %29, %cst {dimension_numbers = #tpu.dot_dimension_numbers<[1], [0], [0], [1], [0, 0, 1, 1], [], []>} : vector<8x36xf32>, vector<36x384xf32>, vector<8x384xf32> -> vector<8x384xf32>
    %31 = vector.broadcast %1 : vector<8x1xf32> to vector<8x384xf32>
    %32 = arith.addf %30, %31 : vector<8x384xf32>
    %cst_13 = arith.constant 0.000000e+00 : f32
    %33 = vector.broadcast %cst_13 : f32 to vector<8x384xf32>
    %34 = arith.maximumf %32, %33 : vector<8x384xf32>
    %35 = arith.index_cast %c0_i32 : i32 to index
    %c0_14 = arith.constant 0 : index
    %c0_15 = arith.constant 0 : index
    %36 = vector.load %arg5[%35, %c0_14, %c0_15] : memref<2x8x384xf32, #tpu.memory_space<vmem>>, vector<1x8x384xf32>
    %37 = vector.shape_cast %36 : vector<1x8x384xf32> to vector<8x384xf32>
    %38 = vector.shape_cast %34 : vector<8x384xf32> to vector<1x8x384xf32>
    tpu.vector_store %arg5[%35, %c0_14, %c0_15], %38 {strides = array<i32>} : memref<2x8x384xf32, #tpu.memory_space<vmem>>, vector<1x8x384xf32>,
    %c1_i32 = arith.constant 1 : i32
    %39 = arith.index_cast %c1_i32 : i32 to index
    %c0_16 = arith.constant 0 : index
    %c0_17 = arith.constant 0 : index
    %40 = vector.load %arg2[%39, %c0_16, %c0_17] : memref<2x4x512xf32, #tpu.memory_space<vmem>>, vector<1x4x384xf32>
    %41 = vector.shape_cast %40 : vector<1x4x384xf32> to vector<4x384xf32>
    %42 = arith.index_cast %c1_i32 : i32 to index
    %c0_18 = arith.constant 0 : index
    %c1_19 = arith.constant 1 : index
    %43 = vector.load %arg2[%42, %c0_18, %c1_19] : memref<2x4x512xf32, #tpu.memory_space<vmem>>, vector<1x4x384xf32>
    %44 = vector.shape_cast %43 : vector<1x4x384xf32> to vector<4x384xf32>
    %45 = arith.index_cast %c1_i32 : i32 to index
    %c0_20 = arith.constant 0 : index
    %c2_21 = arith.constant 2 : index
    %46 = vector.load %arg2[%45, %c0_20, %c2_21] : memref<2x4x512xf32, #tpu.memory_space<vmem>>, vector<1x4x384xf32>
    %47 = vector.shape_cast %46 : vector<1x4x384xf32> to vector<4x384xf32>
    %48 = arith.index_cast %c1_i32 : i32 to index
    %c0_22 = arith.constant 0 : index
    %c18_23 = arith.constant 18 : index
    %49 = vector.load %arg2[%48, %c0_22, %c18_23] : memref<2x4x512xf32, #tpu.memory_space<vmem>>, vector<1x4x384xf32>
    %50 = vector.shape_cast %49 : vector<1x4x384xf32> to vector<4x384xf32>
    %51 = arith.index_cast %c1_i32 : i32 to index
    %c0_24 = arith.constant 0 : index
    %c19_25 = arith.constant 19 : index
    %52 = vector.load %arg2[%51, %c0_24, %c19_25] : memref<2x4x512xf32, #tpu.memory_space<vmem>>, vector<1x4x384xf32>
    %53 = vector.shape_cast %52 : vector<1x4x384xf32> to vector<4x384xf32>
    %54 = arith.index_cast %c1_i32 : i32 to index
    %c0_26 = arith.constant 0 : index
    %c20_27 = arith.constant 20 : index
    %55 = vector.load %arg2[%54, %c0_26, %c20_27] : memref<2x4x512xf32, #tpu.memory_space<vmem>>, vector<1x4x384xf32>
    %56 = vector.shape_cast %55 : vector<1x4x384xf32> to vector<4x384xf32>
    %57 = arith.index_cast %c1_i32 : i32 to index
    %c0_28 = arith.constant 0 : index
    %c36_29 = arith.constant 36 : index
    %58 = vector.load %arg2[%57, %c0_28, %c36_29] : memref<2x4x512xf32, #tpu.memory_space<vmem>>, vector<1x4x384xf32>
    %59 = vector.shape_cast %58 : vector<1x4x384xf32> to vector<4x384xf32>
    %60 = arith.index_cast %c1_i32 : i32 to index
    %c0_30 = arith.constant 0 : index
    %c37_31 = arith.constant 37 : index
    %61 = vector.load %arg2[%60, %c0_30, %c37_31] : memref<2x4x512xf32, #tpu.memory_space<vmem>>, vector<1x4x384xf32>
    %62 = vector.shape_cast %61 : vector<1x4x384xf32> to vector<4x384xf32>
    %63 = arith.index_cast %c1_i32 : i32 to index
    %c0_32 = arith.constant 0 : index
    %c38_33 = arith.constant 38 : index
    %64 = vector.load %arg2[%63, %c0_32, %c38_33] : memref<2x4x512xf32, #tpu.memory_space<vmem>>, vector<1x4x384xf32>
    %65 = vector.shape_cast %64 : vector<1x4x384xf32> to vector<4x384xf32>
    %66 = tpu.concatenate %41, %44, %47, %50, %53, %56, %59, %62, %65 in 0 : vector<4x384xf32>, vector<4x384xf32>, vector<4x384xf32>, vector<4x384xf32>, vector<4x384xf32>, vector<4x384xf32>, vector<4x384xf32>, vector<4x384xf32>, vector<4x384xf32> -> vector<36x384xf32>
    %cst_34 = arith.constant dense<0.000000e+00> : vector<8x384xf32>
    %67 = tpu.matmul %0, %66, %cst_34 {dimension_numbers = #tpu.dot_dimension_numbers<[1], [0], [0], [1], [0, 0, 1, 1], [], []>} : vector<8x36xf32>, vector<36x384xf32>, vector<8x384xf32> -> vector<8x384xf32>
    %68 = vector.broadcast %1 : vector<8x1xf32> to vector<8x384xf32>
    %69 = arith.addf %67, %68 : vector<8x384xf32>
    %cst_35 = arith.constant 0.000000e+00 : f32
    %70 = vector.broadcast %cst_35 : f32 to vector<8x384xf32>
    %71 = arith.maximumf %69, %70 : vector<8x384xf32>
    %72 = arith.index_cast %c1_i32 : i32 to index
    %c0_36 = arith.constant 0 : index
    %c0_37 = arith.constant 0 : index
    %73 = vector.load %arg5[%72, %c0_36, %c0_37] : memref<2x8x384xf32, #tpu.memory_space<vmem>>, vector<1x8x384xf32>
    %74 = vector.shape_cast %73 : vector<1x8x384xf32> to vector<8x384xf32>
    %75 = vector.shape_cast %71 : vector<8x384xf32> to vector<1x8x384xf32>
    tpu.vector_store %arg5[%72, %c0_36, %c0_37], %75 {strides = array<i32>} : memref<2x8x384xf32, #tpu.memory_space<vmem>>, vector<1x8x384xf32>,
    %c2_i32 = arith.constant 2 : i32
    return
  }
  func.func @transform_0(%arg0: i32, %arg1: i32) -> (i32, i32, i32) {
    %c0_i32 = arith.constant 0 : i32
    %c0_i32_0 = arith.constant 0 : i32
    %c0_i32_1 = arith.constant 0 : i32
    return %arg0, %c0_i32, %c0_i32_0 : i32, i32, i32
  }
  func.func @transform_1(%arg0: i32, %arg1: i32) -> (i32, i32) {
    %c0_i32 = arith.constant 0 : i32
    %c0_i32_0 = arith.constant 0 : i32
    return %arg1, %c0_i32 : i32, i32
  }
  func.func @transform_2(%arg0: i32, %arg1: i32) -> (i32, i32) {
    %c0_i32 = arith.constant 0 : i32
    %c0_i32_0 = arith.constant 0 : i32
    return %arg1, %c0_i32 : i32, i32
  }
  func.func @transform_3(%arg0: i32, %arg1: i32) -> (i32, i32, i32) {
    %c0_i32 = arith.constant 0 : i32
    %c0_i32_0 = arith.constant 0 : i32
    return %arg0, %arg1, %c0_i32 : i32, i32, i32
  }
}

</mosaic_0001>

<bundles_post_ra>
// kernel: tpu_custom_call.1
= control target key start
LH: loop header
LB: loop body
LE: loop exit
PB: predicated region body
PF: predicated region fallthrough
CT: control target
= control target key end

     0   :  { %8 = vsyncpa [#allocation3], 0  ;;  %s1153_s0 = inlined_call_operand.hbm [shape: f32[2,4,512], index: 0, kind: input, shape index: {}]   ;;  %s1154_s1 = inlined_call_operand.vmem [shape: f32[8,36], index: 1, kind: input, shape index: {}]   ;;  %s1155_s2 = inlined_call_operand.vmem [shape: f32[8,1], index: 2, kind: input, shape index: {}]   ;;  %s1156_s3 = inlined_call_operand.hbm [shape: f32[2,8,384], index: 3, kind: output, shape index: {}]  }
   0x1   :  { %9 = vsyncpa [#allocation4], 0  ;;  %s927_s12 = smov [#allocation2]   ;;  %s879_s16 = scalar_lea.hbm %s1153_s0, 512 }
   0x2   :  { %s15_s13 = sshll.u32 %s927_s12, 4  ;;  %p880_p0 = scmp.ne.s32.totalorder %s1153_s0, %s879_s16  ;;  %s16_s13 = int_to_ptr.vmem [resolvable:$true] %s15_s13 }
   0x3   :  { %p883_p1 = scmp.lt.u32.totalorder %s879_s16, %s1153_s0 }
   0x5   :  { %p885_p2 = pnand %p883_p1, %p880_p0 }
   0x7   :  { %888 = shalt.err (!%p885_p2)
}
   0x8   :  { %s889_s21 = scalar_lea.vmem %s16_s13, 512  ;;  %p894_p4 = scmp.lt.s32.totalorder %s16_s13, %s16_s13 }
   0x9   :  { %p890_p3 = scmp.ne.s32.totalorder %s16_s13, %s889_s21  ;;  %p895_p5 = scmp.lt.s32.totalorder %s889_s21, %s889_s21 }
   0xb   :  { %p896_p6 = por %p895_p5, %p894_p4 }
   0xd   :  { %p897_p7 = pnand %p896_p6, %p890_p3 }
   0xf   :  { %900 = shalt.err (!%p897_p7)
}
  0x10   :  { %s928_s22 = smov 256   ;;  %s929_s23 = smov 16  }
  0x11   :  { %21 = dma.hbm_to_vmem [thread:$0]  %s1153_s0, 512, %s16_s13, [#allocation3], %s928_s22, %s928_s22, %s929_s23  }
  0x12   :  { %923 = dma.done.wait [#allocation3], 512  }
  0x13   :  { %924 = vsyncadd [#allocation3], 4294966784  ;;  %v977_v0 = vld [vmem:[#allocation2] sm:$0xff]  ;;  %v33_v1 = vld [vmem:[#allocation2 + $0x8] sm:$0xff]  ;;  %s930_s26 = smov 110   ;;  %s931_s27 = smov 127  }
  0x14   :  { %v39_v2 = vcombine.low %v33_v1, %v33_v1  ;;  %v38_v3 = vcombine.low %v977_v0, %v977_v0  ;;  %v983_v4 = vcombine.high %v977_v0, %v977_v0  ;;  %v55_v8 = vcombine.high %v33_v1, %v33_v1  ;;  %s932_s0 = smov 126   ;;  %s934_s28 = smov 108   ;;  %v999_v11 = vld [vmem:[#allocation2 + $0x10] sm:$0xff]  ;;  %v336_v12 = vld [vmem:[#allocation2 + $0x18] sm:$0xff]  ;;  %v30_v23 = vld [vmem:[%s1155_s2] sm:$0xff] }
  0x15   :  { %v933_v10 = vmov 0.0|0.0   ;;  %s935_s29 = smov 109   ;;  %s936_s30 = smov 91   ;;  %v1003_v13 = vcombine.high %v999_v11, %v999_v11  ;;  %v342_v14 = vcombine.low %v336_v12, %v336_v12  ;;  %v341_v17 = vcombine.low %v999_v11, %v999_v11  ;;  %v32_v49 = vld [vmem:[#allocation2 + $0x8] sm:$0xf] }
  0x16   :  { %v740_v5 = vpack.i.bf16 %v39_v2, %v977_v0  ;;  %v745_v6 = vpack.i.bf16 %v33_v1, %v38_v3  ;;  %v735_v7 = vpack.i.bf16 %v33_v1, %v983_v4  ;;  %v750_v9 = vpack.i.bf16 %v55_v8, %v977_v0  ;;  %692 = vmatprep.subr.bf16.mxu1 %v933_v10  ;;  %s937_s4 = smov 92   ;;  %s938_s5 = smov 90  }
  0x17   :  { %v805_v15 = vpack.i.bf16 %v336_v12, %v1003_v13  ;;  %v800_v16 = vpack.i.bf16 %v342_v14, %v999_v11  ;;  %v815_v18 = vpack.i.bf16 %v336_v12, %v341_v17  ;;  %v357_v19 = vcombine.high %v336_v12, %v336_v12 }
  0x18   :  { %741 = vrot.lane.b32.xlu1 %v740_v5, %s930_s26  ;;  %731 = vrot.lane.b32.xlu0 %v740_v5, %s931_s27  ;;  %v939_v20 = vmov 0.0   ;;  %vm940_vm0 = vmmov 0   ;;  %v941_v22 = vmov 0   ;;  %vm48_vm1 = vcmask 1039360  }
  0x19   :  { %250 = vmatprep.mubr.f32.mxu0 %v939_v20  ;;  %668 = vmatprep.mubr.msk.f32.mxu1 %vm940_vm0, %v939_v20  ;;  %v820_v21 = vpack.i.bf16 %v357_v19, %v999_v11  ;;  %vm64_vm2 = vcmask 1031168   ;;  %vm79_vm3 = vcmask 900096   ;;  %vm158_vm4 = vcmask 1043456  }
  0x1a   :  { %870 = vset.pattern.permute.xlu0 %v941_v22  ;;  %vm109_vm5 = vcmask 883712   ;;  %vm94_vm6 = vcmask 891904   ;;  %vm139_vm7 = vcmask 744448   ;;  %vm124_vm8 = vcmask 752640  }
  0x1b   :  { %vm154_vm9 = vcmask 736256   ;;  %vm176_vm10 = vcmask 293888  }
  0x1c   :  { %746 = vrot.lane.b32.xlu1 %v745_v6, %s931_s27  ;;  %736 = vrot.lane.b32.xlu0 %v735_v7, %s932_s0 }
  0x20   :  { %756 = vrot.lane.b32.xlu1 %v745_v6, %s930_s26  ;;  %751 = vrot.lane.b32.xlu0 %v750_v9, %s932_s0 }
  0x24   :  { %766 = vrot.lane.b32.xlu1 %v740_v5, %s934_s28  ;;  %761 = vrot.lane.b32.xlu0 %v735_v7, %s935_s29 }
  0x28   :  { %776 = vrot.lane.b32.xlu1 %v740_v5, %s936_s30  ;;  %771 = vrot.lane.b32.xlu0 %v735_v7, %s937_s4 }
  0x2c   :  { %786 = vrot.lane.b32.xlu1 %v745_v6, %s934_s28  ;;  %781 = vrot.lane.b32.xlu0 %v750_v9, %s935_s29 }
  0x30   :  { %796 = vrot.lane.b32.xlu1 %v745_v6, %s936_s30  ;;  %791 = vrot.lane.b32.xlu0 %v750_v9, %s937_s4 }
  0x34   :  { %806 = vrot.lane.b32.xlu1 %v805_v15, %s932_s0  ;;  %801 = vrot.lane.b32.xlu0 %v800_v16, %s931_s27 }
  0x38   :  { %148 = vrot.lane.b32.xlu1 %v983_v4, %s938_s5  ;;  %811 = vrot.lane.b32.xlu0 %v800_v16, %s930_s26 }
  0x3c   :  { %816 = vrot.lane.b32.xlu1 %v815_v18, %s931_s27  ;;  %150 = vrot.lane.b32.xlu0 %v33_v1, %s938_s5 }
  0x40   :  { %826 = vrot.lane.b32.xlu1 %v815_v18, %s930_s26  ;;  %821 = vrot.lane.b32.xlu0 %v820_v21, %s932_s0 }
  0x44   :  { %152 = vrot.lane.b32.xlu1 %v55_v8, %s938_s5  ;;  %146 = vrot.lane.b32.xlu0 %v977_v0, %s938_s5 }
  0x48   :  { %836 = vrot.lane.b32.xlu1 %v800_v16, %s934_s28  ;;  %831 = vrot.lane.b32.xlu0 %v805_v15, %s935_s29 }
  0x4c   :  { %846 = vrot.lane.b32.xlu1 %v800_v16, %s936_s30  ;;  %841 = vrot.lane.b32.xlu0 %v805_v15, %s937_s4 }
  0x50   :  { %856 = vrot.lane.b32.xlu1 %v815_v18, %s934_s28  ;;  %851 = vrot.lane.b32.xlu0 %v820_v21, %s935_s29 }
  0x54   :  { %866 = vrot.lane.b32.xlu1 %v815_v18, %s936_s30  ;;  %861 = vrot.lane.b32.xlu0 %v820_v21, %s937_s4 }
  0x58   :  { %446 = vrot.lane.b32.xlu1 %v336_v12, %s938_s5  ;;  %444 = vrot.lane.b32.xlu0 %v1003_v13, %s938_s5 }
  0x5c   :  { %448 = vrot.lane.b32.xlu1 %v357_v19, %s938_s5  ;;  %442 = vrot.lane.b32.xlu0 %v999_v11, %s938_s5 }
  0x60   :  { %173 = vperm.xlu0 %870, %v30_v23  }
  0x8a   :  { %v742_v24 = vpop.permute.xlu1 %741  ;;  %v732_v25 = vpop.permute.xlu0 %731 }
  0x8b   :  { %v734_v26 = vunpack.i.h.bf16 %v732_v25  ;;  %v733_v27 = vunpack.i.l.bf16 %v732_v25  ;;  %v744_v28 = vunpack.i.h.bf16 %v742_v24  ;;  %v743_v29 = vunpack.i.l.bf16 %v742_v24 }
  0x8d   :  { %v50_v34 = vsel %vm48_vm1, %v733_v27, %v734_v26  ;;  %v81_v38 = vsel %vm79_vm3, %v743_v29, %v744_v28 }
  0x8e   :  { %v747_v30 = vpop.permute.xlu1 %746  ;;  %v737_v31 = vpop.permute.xlu0 %736  ;;  %v160_v41 = vsel %vm158_vm4, %v983_v4, %v50_v34 }
  0x8f   :  { %v739_v32 = vunpack.i.h.bf16 %v737_v31  ;;  %v738_v33 = vunpack.i.l.bf16 %v737_v31  ;;  %v749_v35 = vunpack.i.h.bf16 %v747_v30  ;;  %v748_v36 = vunpack.i.l.bf16 %v747_v30 }
  0x91   :  { %v66_v37 = vsel %vm64_vm2, %v738_v33, %v739_v32  ;;  %v49_v48 = vsel %vm48_vm1, %v748_v36, %v733_v27  ;;  %v51_v50 = vsel %vm48_vm1, %v734_v26, %v749_v35 }
  0x92   :  { %v757_v39 = vpop.permute.xlu1 %756  ;;  %v752_v40 = vpop.permute.xlu0 %751  ;;  %v163_v42 = vsel %vm158_vm4, %v66_v37, %v81_v38  ;;  %v159_v61 = vsel %vm158_vm4, %v977_v0, %v49_v48  ;;  %v161_v62 = vsel %vm158_vm4, %v32_v49, %v51_v50 }
  0x93   :  { %v759_v43 = vunpack.i.h.bf16 %v757_v39  ;;  %v758_v44 = vunpack.i.l.bf16 %v757_v39  ;;  %v754_v45 = vunpack.i.h.bf16 %v752_v40  ;;  %v753_v46 = vunpack.i.l.bf16 %v752_v40 }
  0x94   :  { %v684_v47 = vpack.c.bf16 %v163_v42, %v160_v41 }
  0x95   :  { %v65_v51 = vsel %vm64_vm2, %v753_v46, %v738_v33  ;;  %v80_v52 = vsel %vm79_vm3, %v758_v44, %v743_v29  ;;  %v67_v53 = vsel %vm64_vm2, %v739_v32, %v754_v45  ;;  %v82_v54 = vsel %vm79_vm3, %v744_v28, %v759_v43 }
  0x96   :  { %685 = vmatprep.subr.bf16.mxu0 %v684_v47  ;;  %v767_v55 = vpop.permute.xlu1 %766  ;;  %v762_v56 = vpop.permute.xlu0 %761  ;;  %v162_v57 = vsel %vm158_vm4, %v65_v51, %v80_v52  ;;  %v164_v58 = vsel %vm158_vm4, %v67_v53, %v82_v54 }
  0x97   :  { %v769_v59 = vunpack.i.h.bf16 %v767_v55  ;;  %v768_v60 = vunpack.i.l.bf16 %v767_v55  ;;  %v764_v63 = vunpack.i.h.bf16 %v762_v56  ;;  %v763_v1 = vunpack.i.l.bf16 %v762_v56 }
  0x98   :  { %v686_v2 = vpack.c.bf16 %v162_v57, %v159_v61  ;;  %v693_v3 = vpack.c.bf16 %v164_v58, %v161_v62 }
  0x99   :  { %v111_v0 = vsel %vm109_vm5, %v768_v60, %v769_v59  ;;  %v96_v12 = vsel %vm94_vm6, %v763_v1, %v764_v63 }
  0x9a   :  { %687 = vmatpush1.bf16.msra.mxu0 %v686_v2  ;;  %694 = vmatpush3.bf16.msra.mxu1 %v693_v3  ;;  %v777_v4 = vpop.permute.xlu1 %776  ;;  %v772_v5 = vpop.permute.xlu0 %771  ;;  %v166_v21 = vsel %vm158_vm4, %v96_v12, %v111_v0  ;;  %v335_v12 = vld [vmem:[#allocation2 + $0x18] sm:$0xf] }
  0x9b   :  { %v779_v6 = vunpack.i.h.bf16 %v777_v4  ;;  %v778_v7 = vunpack.i.l.bf16 %v777_v4  ;;  %v774_v8 = vunpack.i.h.bf16 %v772_v5  ;;  %v773_v9 = vunpack.i.l.bf16 %v772_v5  ;;  %695 = vmatprep.subr.bf16.mxu1 %v933_v10 }
  0x9d   :  { %v141_v14 = vsel %vm139_vm7, %v778_v7, %v779_v6  ;;  %v126_v15 = vsel %vm124_vm8, %v773_v9, %v774_v8 }
  0x9e   :  { %v787_v16 = vpop.permute.xlu1 %786  ;;  %v782_v17 = vpop.permute.xlu0 %781  ;;  %v169_v18 = vsel %vm158_vm4, %v126_v15, %v141_v14 }
  0x9f   :  { %v789_v19 = vunpack.i.h.bf16 %v787_v16  ;;  %v788_v22 = vunpack.i.l.bf16 %v787_v16  ;;  %v784_v23 = vunpack.i.h.bf16 %v782_v17  ;;  %v783_v24 = vunpack.i.l.bf16 %v782_v17 }
  0xa0   :  { %v688_v25 = vpack.c.bf16 %v169_v18, %v166_v21 }
  0xa1   :  { %v110_v32 = vsel %vm109_vm5, %v788_v22, %v768_v60  ;;  %v112_v33 = vsel %vm109_vm5, %v769_v59, %v789_v19  ;;  %v95_v34 = vsel %vm94_vm6, %v783_v24, %v763_v1  ;;  %v97_v35 = vsel %vm94_vm6, %v764_v63, %v784_v23 }
  0xa2   :  { %689 = vmatprep.subr.bf16.mxu0 %v688_v25  ;;  %v797_v26 = vpop.permute.xlu1 %796  ;;  %v792_v27 = vpop.permute.xlu0 %791  ;;  %v165_v44 = vsel %vm158_vm4, %v95_v34, %v110_v32  ;;  %v167_v45 = vsel %vm158_vm4, %v97_v35, %v112_v33 }
  0xa3   :  { %v799_v28 = vunpack.i.h.bf16 %v797_v26  ;;  %v798_v29 = vunpack.i.l.bf16 %v797_v26  ;;  %v794_v30 = vunpack.i.h.bf16 %v792_v27  ;;  %v793_v31 = vunpack.i.l.bf16 %v792_v27  ;;  %v1099_v27 = vld [vmem:[%s1154_s1] sm:$0xff]  ;;  %s942_s1 = smov [#allocation5]  }
  0xa4   :  { %s624_s9 = sshll.u32 %s942_s1, 4  ;;  %s625_s9 = int_to_ptr.vmem [resolvable:$true] %s624_s9 }
  0xa5   :  { %v140_v36 = vsel %vm139_vm7, %v798_v29, %v778_v7  ;;  %v142_v37 = vsel %vm139_vm7, %v779_v6, %v799_v28  ;;  %v125_v38 = vsel %vm124_vm8, %v793_v31, %v773_v9  ;;  %v127_v39 = vsel %vm124_vm8, %v774_v8, %v794_v30  ;;  %s901_s10 = scalar_lea.vmem %s625_s9, 768  ;;  %p906_p9 = scmp.lt.s32.totalorder %s625_s9, %s625_s9 }
  0xa6   :  { %v807_v40 = vpop.permute.xlu1 %806  ;;  %v802_v41 = vpop.permute.xlu0 %801  ;;  %v168_v42 = vsel %vm158_vm4, %v125_v38, %v140_v36  ;;  %v170_v43 = vsel %vm158_vm4, %v127_v39, %v142_v37  ;;  %p902_p8 = scmp.ne.s32.totalorder %s625_s9, %s901_s10  ;;  %p907_p10 = scmp.lt.s32.totalorder %s901_s10, %s901_s10 }
  0xa7   :  { %v690_v46 = vpack.c.bf16 %v168_v42, %v165_v44  ;;  %v696_v47 = vpack.c.bf16 %v170_v43, %v167_v45  ;;  %v804_v50 = vunpack.i.h.bf16 %v802_v41  ;;  %v803_v51 = vunpack.i.l.bf16 %v802_v41 }
  0xa8   :  { %v809_v54 = vunpack.i.h.bf16 %v807_v40  ;;  %v808_v55 = vunpack.i.l.bf16 %v807_v40  ;;  %p908_p11 = por %p907_p10, %p906_p9 }
  0xa9   :  { %691 = vmatpush1.bf16.msra.mxu0 %v690_v46  ;;  %697 = vmatpush3.bf16.msra.mxu1 %v696_v47  ;;  %v352_v59 = vsel %vm48_vm1, %v803_v51, %v804_v50 }
  0xaa   :  { %v149_v48 = vpop.permute.xlu1 %148  ;;  %v812_v49 = vpop.permute.xlu0 %811  ;;  %666 = vmatprep.subr.mxu1 %v939_v20  ;;  %v367_v63 = vsel %vm64_vm2, %v808_v55, %v809_v54  ;;  %v454_v6 = vsel %vm158_vm4, %v1003_v13, %v352_v59  ;;  %p909_p12 = pnand %p908_p11, %p902_p8 }
  0xab   :  { %v814_v52 = vunpack.i.h.bf16 %v812_v49  ;;  %v813_v53 = vunpack.i.l.bf16 %v812_v49 }
  0xad   :  { %v381_v56 = vsel %vm79_vm3, %v813_v53, %v814_v52 }
  0xae   :  { %v817_v57 = vpop.permute.xlu1 %816  ;;  %v151_v58 = vpop.permute.xlu0 %150  ;;  %v457_v1 = vsel %vm158_vm4, %v367_v63, %v381_v56 }
  0xaf   :  { %v819_v60 = vunpack.i.h.bf16 %v817_v57  ;;  %v818_v61 = vunpack.i.l.bf16 %v817_v57  ;;  %v156_v62 = vsel %vm154_vm9, %v149_v48, %v151_v58  ;;  %v698_v14 = vpack.c.bf16 %v457_v1, %v454_v6 }
  0xb0   :  { %636 = vmatprep.subr.msk.mxu0 %vm158_vm4, %v156_v62 }
  0xb1   :  { %v351_v2 = vsel %vm48_vm1, %v818_v61, %v803_v51  ;;  %v353_v3 = vsel %vm48_vm1, %v804_v50, %v819_v60 }
  0xb2   :  { %v827_v4 = vpop.permute.xlu1 %826  ;;  %v822_v5 = vpop.permute.xlu0 %821  ;;  %v453_v13 = vsel %vm158_vm4, %v999_v11, %v351_v2  ;;  %v455_v23 = vsel %vm158_vm4, %v335_v12, %v353_v3 }
  0xb3   :  { %v829_v7 = vunpack.i.h.bf16 %v827_v4  ;;  %v828_v8 = vunpack.i.l.bf16 %v827_v4  ;;  %v824_v9 = vunpack.i.h.bf16 %v822_v5  ;;  %v823_v0 = vunpack.i.l.bf16 %v822_v5 }
  0xb5   :  { %v380_v15 = vsel %vm79_vm3, %v828_v8, %v813_v53  ;;  %v382_v16 = vsel %vm79_vm3, %v814_v52, %v829_v7  ;;  %v368_v17 = vsel %vm64_vm2, %v809_v54, %v824_v9  ;;  %v366_v18 = vsel %vm64_vm2, %v823_v0, %v808_v55 }
  0xb6   :  { %v153_v19 = vpop.permute.xlu1 %152  ;;  %v147_v21 = vpop.permute.xlu0 %146  ;;  %v456_v22 = vsel %vm158_vm4, %v366_v18, %v380_v15  ;;  %v458_v24 = vsel %vm158_vm4, %v368_v17, %v382_v16 }
  0xb7   :  { %v157_v25 = vsel %vm154_vm9, %v151_v58, %v153_v19  ;;  %v155_v26 = vsel %vm154_vm9, %v147_v21, %v149_v48  ;;  %v700_v28 = vpack.c.bf16 %v456_v22, %v453_v13  ;;  %v707_v29 = vpack.c.bf16 %v458_v24, %v455_v23 }
  0xb8   :  { %637 = vmatpush1.msk.msra.mxu0 %vm158_vm4, %v155_v26  ;;  %667 = vmatpush3.msk.msra.mxu1 %vm158_vm4, %v157_v25 }
  0xb9   :  { %699 = vmatprep.subr.bf16.mxu0 %v698_v14  ;;  %706 = vmatprep.subr.bf16.mxu1 %v933_v10 }
  0xba   :  { %v837_v11 = vpop.permute.xlu1 %836  ;;  %v832_v30 = vpop.permute.xlu0 %831  ;;  %638 = vmatmul.mubr.msk.f32.vlgmr.msra.gmra.mrb[0].mxu0 %vm176_vm10, %v1099_v27  ;;  %669 = vmatmul.mubr.msk.f32.vlgmr.msra.gmra.mrb[0].mxu1 %vm176_vm10, %v1099_v27 }
  0xbb   :  { %v839_v31 = vunpack.i.h.bf16 %v837_v11  ;;  %v838_v32 = vunpack.i.l.bf16 %v837_v11  ;;  %v834_v33 = vunpack.i.h.bf16 %v832_v30  ;;  %v833_v34 = vunpack.i.l.bf16 %v832_v30  ;;  %701 = vmatpush1.bf16.msra.mxu0 %v700_v28  ;;  %708 = vmatpush3.bf16.msra.mxu1 %v707_v29 }
  0xbc   :  { %709 = vmatprep.subr.bf16.mxu1 %v933_v10  ;;  %535 = vmatprep.mubr.f32.mxu0 %v939_v20 }
  0xbd   :  { %681 = vmatprep.mubr.msk.f32.mxu1 %vm940_vm0, %v939_v20  ;;  %v409_v35 = vsel %vm109_vm5, %v838_v32, %v839_v31  ;;  %v395_v36 = vsel %vm94_vm6, %v833_v34, %v834_v33 }
  0xbe   :  { %v847_v37 = vpop.permute.xlu1 %846  ;;  %v842_v38 = vpop.permute.xlu0 %841  ;;  %v460_v46 = vsel %vm158_vm4, %v395_v36, %v409_v35 }
  0xbf   :  { %v849_v39 = vunpack.i.h.bf16 %v847_v37  ;;  %v848_v40 = vunpack.i.l.bf16 %v847_v37  ;;  %v844_v41 = vunpack.i.h.bf16 %v842_v38  ;;  %v843_v42 = vunpack.i.l.bf16 %v842_v38 }
  0xc1   :  { %v437_v43 = vsel %vm139_vm7, %v848_v40, %v849_v39  ;;  %v423_v44 = vsel %vm124_vm8, %v843_v42, %v844_v41 }
  0xc2   :  { %v857_v10 = vpop.permute.xlu1 %856  ;;  %v852_v45 = vpop.permute.xlu0 %851  ;;  %v463_v47 = vsel %vm158_vm4, %v423_v44, %v437_v43 }
  0xc3   :  { %v859_v48 = vunpack.i.h.bf16 %v857_v10  ;;  %v858_v49 = vunpack.i.l.bf16 %v857_v10  ;;  %v854_v50 = vunpack.i.h.bf16 %v852_v45  ;;  %v853_v51 = vunpack.i.l.bf16 %v852_v45 }
  0xc4   :  { %v702_v52 = vpack.c.bf16 %v463_v47, %v460_v46 }
  0xc5   :  { %v408_v53 = vsel %vm109_vm5, %v858_v49, %v838_v32  ;;  %v410_v54 = vsel %vm109_vm5, %v839_v31, %v859_v48  ;;  %v394_v55 = vsel %vm94_vm6, %v853_v51, %v833_v34  ;;  %v396_v56 = vsel %vm94_vm6, %v834_v33, %v854_v50 }
  0xc6   :  { %703 = vmatprep.subr.bf16.mxu0 %v702_v52  ;;  %v867_v57 = vpop.permute.xlu1 %866  ;;  %v862_v58 = vpop.permute.xlu0 %861  ;;  %v459_v6 = vsel %vm158_vm4, %v394_v55, %v408_v53  ;;  %v461_v8 = vsel %vm158_vm4, %v396_v56, %v410_v54 }
  0xc7   :  { %v869_v59 = vunpack.i.h.bf16 %v867_v57  ;;  %v868_v60 = vunpack.i.l.bf16 %v867_v57  ;;  %v864_v61 = vunpack.i.h.bf16 %v862_v58  ;;  %v863_v62 = vunpack.i.l.bf16 %v862_v58 }
  0xc9   :  { %v436_v63 = vsel %vm139_vm7, %v868_v60, %v848_v40  ;;  %v438_v1 = vsel %vm139_vm7, %v849_v39, %v869_v59  ;;  %v422_v2 = vsel %vm124_vm8, %v863_v62, %v843_v42  ;;  %v424_v3 = vsel %vm124_vm8, %v844_v41, %v864_v61 }
  0xca   :  { %v447_v4 = vpop.permute.xlu1 %446  ;;  %v445_v5 = vpop.permute.xlu0 %444  ;;  %v462_v7 = vsel %vm158_vm4, %v422_v2, %v436_v63  ;;  %v464_v9 = vsel %vm158_vm4, %v424_v3, %v438_v1 }
  0xcb   :  { %v451_v0 = vsel %vm154_vm9, %v445_v5, %v447_v4  ;;  %v704_v12 = vpack.c.bf16 %v462_v7, %v459_v6  ;;  %v710_v14 = vpack.c.bf16 %v464_v9, %v461_v8 }
  0xcd   :  { %705 = vmatpush1.bf16.msra.mxu0 %v704_v12  ;;  %711 = vmatpush3.bf16.msra.mxu1 %v710_v14 }
  0xce   :  { %v449_v15 = vpop.permute.xlu1 %448  ;;  %v443_v16 = vpop.permute.xlu0 %442  ;;  %641 = vmatprep.subr.msk.mxu0 %vm158_vm4, %v451_v0  ;;  %679 = vmatprep.subr.mxu1 %v939_v20 }
  0xcf   :  { %v452_v17 = vsel %vm154_vm9, %v447_v4, %v449_v15  ;;  %v450_v18 = vsel %vm154_vm9, %v443_v16, %v445_v5 }
  0xd1   :  { %642 = vmatpush1.msk.msra.mxu0 %vm158_vm4, %v450_v18  ;;  %680 = vmatpush3.msk.msra.mxu1 %vm158_vm4, %v452_v17 }
  0xd2   :  { %643 = vmatmul.mubr.msk.f32.vlgmr.msra.gmra.mrb[2].mxu0 %vm176_vm10, %v1099_v27  ;;  %682 = vmatmul.mubr.msk.f32.vlgmr.msra.gmra.mrb[2].mxu1 %vm176_vm10, %v1099_v27 }
  0xdf   :  { %v174_v19 = vpop.permute.xlu0 %173 }
 0x18d   :  { %v252_v21 = vpop.f32.mrb[0].mxu0  ;;  %v323_v13 = vpop.f32.mrb[0].mxu1 }
 0x18e   :  { %v253_v22 = vadd.f32 %v252_v21, %v174_v19  ;;  %v254_v23 = vpop.f32.mrb[1].mxu0  ;;  %v324_v20 = vadd.f32 %v323_v13, %v174_v19  ;;  %v670_v24 = vpop.f32.mrb[1].mxu1 }
 0x18f   :  { %v255_v25 = vadd.f32 %v254_v23, %v174_v19 }
 0x190   :  { %v327_v26 = vmax.f32 %v253_v22, 0.0  ;;  %v329_v28 = vmax.f32 %v324_v20, 0.0 }
 0x191   :  { %v328_v29 = vmax.f32 %v255_v25, 0.0 }
 0x192   :  { %330 = vst [vmem:[#allocation5] sm:$0xff] %v327_v26  ;;  %332 = vst [vmem:[#allocation5 + $0x10] sm:$0xff] %v329_v28 }
 0x193   :  { %331 = vst [vmem:[#allocation5 + $0x8] sm:$0xff] %v328_v29 }
 0x1a5   :  { %v537_v11 = vpop.f32.mrb[2].mxu0  ;;  %v608_v30 = vpop.f32.mrb[2].mxu1 }
 0x1a6   :  { %v538_v31 = vadd.f32 %v537_v11, %v174_v19  ;;  %v609_v32 = vadd.f32 %v608_v30, %v174_v19  ;;  %v539_v33 = vpop.f32.mrb[3].mxu0  ;;  %v683_v27 = vpop.f32.mrb[3].mxu1 }
 0x1a7   :  { %v540_v34 = vadd.f32 %v539_v33, %v174_v19 }
 0x1a8   :  { %v612_v35 = vmax.f32 %v538_v31, 0.0  ;;  %v614_v36 = vmax.f32 %v609_v32, 0.0 }
 0x1a9   :  { %v613_v37 = vmax.f32 %v540_v34, 0.0 }
 0x1aa   :  { %616 = vst [vmem:[#allocation5 + $0x18] sm:$0xff] %v612_v35  ;;  %618 = vst [vmem:[#allocation5 + $0x28] sm:$0xff] %v614_v36 }
 0x1ab   :  { %617 = vst [vmem:[#allocation5 + $0x20] sm:$0xff] %v613_v37 }
 0x1ac   :  { %912 = shalt.err (!%p909_p12)
}
 0x1ad   :  { %s913_s13 = scalar_lea.hbm %s1156_s3, 768 }
 0x1ae   :  { %p914_p13 = scmp.ne.s32.totalorder %s1156_s3, %s913_s13  ;;  %p917_p0 = scmp.lt.u32.totalorder %s913_s13, %s1156_s3 }
 0x1b0   :  { %p919_p1 = pnand %p917_p0, %p914_p13 }
 0x1b2   :  { %922 = shalt.err (!%p919_p1)
}
 0x1b3   :  { %s943_s18 = smov 384   ;;  %s944_s19 = smov 24  }
 0x1b4   :  { %630 = dma.vmem_to_hbm [thread:$0]  %s625_s9, 768, %s1156_s3, [#allocation4], %s943_s18, %s943_s18, %s944_s19  }
 0x1b5   :  { %925 = dma.done.wait [#allocation4], 768  }
 0x1b6   :  { %926 = vsyncadd [#allocation4], 4294966528 }
 0x1b7   :  { %634 = vsyncpa [#allocation3], 1 }
 0x1b8   :  { %635 = vsyncpa [#allocation4], 1 }

</bundles_post_ra>
